<compile_context>
chip_gen: v7x
topology: tpu7x:2x2x1
jax: 0.10.0
libtpu: 0.0.40
codegen_flags: <defaults>
</compile_context>

<pallas_src>
import functools
import math

import jax
import jax.numpy as jnp
from jax import lax
from jax.experimental import pallas as pl
from jax.experimental.pallas import tpu as pltpu


def _round_up(x, m):
    return (x + m - 1) // m * m


def _conv3x3_kernel(x_main_ref, x_halo_ref, w_ref, b_ref, o_ref, xbuf_ref, *,
                    wp, tile_h, tap_offsets):
    # x_main_ref: (1, tile_h*wp, K)        bf16  this tile's padded rows
    # x_halo_ref: (1, 2*wp, K)             bf16  2-row bottom halo
    # w_ref:      (n_taps, K, cout_pad)    bf16
    # b_ref:      (1, cout_pad)            f32
    # o_ref:      (1, tile_h*wp, cout_pad) bf16
    # xbuf_ref:   (buf_rows, K)            bf16 scratch (contiguous halo window)
    rows = tile_h * wp
    # Assemble the (tile_h+2)-row window contiguously so every conv tap is one
    # sublane-aligned slice (wp is a multiple of 8).
    xbuf_ref[0:rows, :] = x_main_ref[0]
    xbuf_ref[rows:rows + 2 * wp, :] = x_halo_ref[0]
    tail = xbuf_ref.shape[0] - (rows + 2 * wp)
    if tail:  # only the 9-tap (kw-shifted) path over-reads 2 rows; keep them 0
        xbuf_ref[rows + 2 * wp:, :] = jnp.zeros(
            (tail, xbuf_ref.shape[1]), xbuf_ref.dtype)

    # Accumulate every tap into one f32 value: lets the compiler chain MXU
    # accumulation instead of n_taps read-modify-write VMEM scratch passes.
    acc = jnp.dot(xbuf_ref[pl.ds(tap_offsets[0], rows), :], w_ref[0],
                  preferred_element_type=jnp.float32)
    for i in range(1, len(tap_offsets)):
        acc = acc + jnp.dot(xbuf_ref[pl.ds(tap_offsets[i], rows), :], w_ref[i],
                            preferred_element_type=jnp.float32)
    # Bias + single lane/sublane-dense store of the padded-width block; wrap
    # columns and Cout padding are stripped once in the wrapper.
    o_ref[0, :, :] = (acc + b_ref[...]).astype(o_ref.dtype)


def _pick_tile_h(H, W, *, target_rows=512):
    """Even tile height giving ~target_rows output rows per grid step while
    keeping >=2 spatial tiles (both v7x TensorCores busy even at batch=1)."""
    th = _round_up(max(1, -(-target_rows // W)), 2)
    th = min(th, _round_up(H, 2))
    if H > 2:
        nh = max(2, -(-H // th))
        th = _round_up(-(-H // nh), 2)
    return max(2, th)


def _vmem_estimate(tile_h, wp, k_in, n_taps, cout_pad, buf_rows):
    rows = tile_h * wp
    x_main = rows * k_in * 2 * 2            # bf16, double-buffered
    x_halo = 2 * wp * k_in * 2 * 2
    w = n_taps * k_in * cout_pad * 2 * 2
    bias = cout_pad * 4 * 2
    out = rows * cout_pad * 2 * 2           # bf16, double-buffered
    xbuf = buf_rows * k_in * 2
    acc = rows * cout_pad * 4               # f32 accumulator (compiler temp)
    return x_main + x_halo + w + bias + out + xbuf + acc


def fused_conv3x3_heads(x_nchw, weights, biases, *, tile_h=None,
                        out_dtype=jnp.float32,
                        vmem_budget=40 * 1024 * 1024):
    """3x3 stride-1 pad-1 conv of several heads sharing one input feature map.

    weights[i]: (Cout_i, Cin, 3, 3), biases[i]: (Cout_i,).  Returns a list of
    (B, H*W, Cout_i) float arrays in NHWC pixel order (= permute(0,2,3,1))."""
    B, Cin, H, W = x_nchw.shape
    couts = [int(w.shape[0]) for w in weights]
    for w_i, c in zip(weights, couts):
        assert w_i.shape == (c, Cin, 3, 3), w_i.shape
    cout_total = sum(couts)
    # 256-wide N fills the v6e/v7x 2x256^2 MXU; 128 is native for small heads
    # and for v5e's 4x128^2 MXU.
    lane_mult = 256 if cout_total > 128 else 128
    cout_pad = _round_up(cout_total, lane_mult)

    wp = _round_up(W + 2, 8)                # padded, sublane-aligned row width
    fold_kw = Cin <= 128                    # K=3*Cin fills the MXU contraction
    k_in = 3 * Cin if fold_kw else Cin
    n_taps = 3 if fold_kw else 9
    if fold_kw:
        tap_offsets = tuple(kh * wp for kh in range(3))
    else:
        tap_offsets = tuple(kh * wp + kw for kh in range(3) for kw in range(3))
    buf_extra = 0 if fold_kw else 8         # 9-tap kw shift over-reads 2 rows

    if tile_h is None:
        tile_h = _pick_tile_h(H, W)
    assert tile_h % 2 == 0 and tile_h >= 2, tile_h

    def _buf_rows(th):
        return (th + 2) * wp + buf_extra

    # Re-derive the tile against the VMEM budget (v7x: 64 MiB physical).
    while tile_h > 2 and _vmem_estimate(tile_h, wp, k_in, n_taps, cout_pad,
                                        _buf_rows(tile_h)) > vmem_budget:
        tile_h -= 2
    nh = -(-H // tile_h)
    h_tiles = nh * tile_h
    buf_rows = _buf_rows(tile_h)
    rows = tile_h * wp
    half_th = tile_h // 2

    # ---- Layout glue (ideally hoisted to the model boundary: NHWC + bf16). --
    x_nhwc = jnp.transpose(x_nchw, (0, 2, 3, 1)).astype(jnp.bfloat16)
    hp = h_tiles + 3                        # 1 top + >=2 bottom zero rows
    x_pad = jnp.pad(x_nhwc, ((0, 0), (1, hp - H - 1), (1, wp - W - 1), (0, 0)))
    xf = x_pad.reshape(B, hp * wp, Cin)
    if fold_kw:
        x_in = jnp.concatenate([xf[:, :-2], xf[:, 1:-1], xf[:, 2:]], axis=-1)
    else:
        x_in = xf

    w_cat = jnp.concatenate(weights, axis=0)              # (cout_total,Cin,3,3)
    wt = jnp.transpose(w_cat, (2, 3, 1, 0))               # (kh, kw, Cin, O)
    wt = wt.reshape(n_taps, k_in, cout_total)             # fold kw into K or kh*3+kw
    w_in = jnp.pad(wt.astype(jnp.bfloat16),
                   ((0, 0), (0, 0), (0, cout_pad - cout_total)))
    b_cat = jnp.concatenate([jnp.asarray(b, jnp.float32).reshape(-1)
                             for b in biases], axis=0)
    b_in = jnp.pad(b_cat, (0, cout_pad - cout_total)).reshape(1, cout_pad)

    est = _vmem_estimate(tile_h, wp, k_in, n_taps, cout_pad, buf_rows)
    vmem_limit = int(min(64 * 1024 * 1024, max(32 * 1024 * 1024, 2 * est)))

    kernel = functools.partial(_conv3x3_kernel, wp=wp, tile_h=tile_h,
                               tap_offsets=tap_offsets)
    out = pl.pallas_call(
        kernel,
        out_shape=jax.ShapeDtypeStruct((B, h_tiles * wp, cout_pad),
                                       jnp.bfloat16),
        grid_spec=pltpu.PrefetchScalarGridSpec(
            num_scalar_prefetch=0,
            grid=(B, nh),
            in_specs=[
                # main tile_h padded rows of this spatial tile
                pl.BlockSpec((1, rows, k_in), lambda b, t: (b, t, 0)),
                # 2-row bottom halo of the same array (overlap across tiles)
                pl.BlockSpec((1, 2 * wp, k_in),
                             lambda b, t: (b, (t + 1) * half_th, 0)),
                # grid-invariant weights / bias
                # TODO(synk): use pipeline_mode=pl.Buffered(1) here once
                # single-buffered grid-invariant operands are supported, to
                # halve the weight slab's VMEM on v7x.
                pl.BlockSpec((n_taps, k_in, cout_pad), lambda b, t: (0, 0, 0)),
                pl.BlockSpec((1, cout_pad), lambda b, t: (0, 0)),
            ],
            out_specs=pl.BlockSpec((1, rows, cout_pad), lambda b, t: (b, t, 0)),
            scratch_shapes=[pltpu.VMEM((buf_rows, k_in), jnp.bfloat16)],
        ),
        compiler_params=pltpu.CompilerParams(
            dimension_semantics=("parallel", "parallel"),
            vmem_limit_bytes=vmem_limit),
    )(x_in, x_in, w_in, b_in)

    # Strip row-width padding, extra tile rows and Cout lane padding; split
    # into per-head outputs (memory order already matches permute(0,2,3,1)).
    o = out.reshape(B, h_tiles, wp, cout_pad)[:, :H, :W, :cout_total]
    o = o.astype(out_dtype).reshape(B, H * W, cout_total)
    outs, off = [], 0
    for c in couts:
        outs.append(o[:, :, off:off + c])
        off += c
    return outs


def retina_cls_head(x, weight, bias, num_anchors, num_cls, **kwargs):
    """RetinaClsHead.forward: (B, Cin, H, W) -> (B, H*W*A, num_cls)."""
    B, _, H, W = x.shape
    (y,) = fused_conv3x3_heads(x, [weight], [bias], **kwargs)
    return y.reshape(B, H * W * num_anchors, num_cls)


def retina_reg_iou_heads(x, w_reg, b_reg, w_iou, b_iou, num_anchors,
                         *, reg_scale=1.0, **kwargs):
    """RetinaRegHead (+ Scale) and IOUPredHead fused over the shared reg tower.

    Returns (reg, iou) with shapes (B, H*W*A, 4) and (B, H*W*A, 1)."""
    B, _, H, W = x.shape
    s = jnp.asarray(reg_scale, jnp.float32)
    # Scale is linear, so it folds into the reg conv's weights/bias for free.
    reg, iou = fused_conv3x3_heads(x, [w_reg * s, w_iou], [b_reg * s, b_iou],
                                   **kwargs)
    return (reg.reshape(B, H * W * num_anchors, 4),
            iou.reshape(B, H * W * num_anchors, 1))


def _ref_head(x, weight, bias, last):
    """Plain-JAX reference mirroring the PyTorch conv head."""
    y = lax.conv_general_dilated(
        x, weight, window_strides=(1, 1), padding=((1, 1), (1, 1)),
        dimension_numbers=("NCHW", "OIHW", "NCHW"))
    y = y + bias[None, :, None, None]
    B = y.shape[0]
    return jnp.transpose(y, (0, 2, 3, 1)).reshape(B, -1, last)


if __name__ == "__main__":
    # Small shapes consistent with the module (scaled-down RetinaNet head).
    B, Cin, H, W = 2, 32, 16, 16
    num_anchors, num_cls = 2, 16

    key = jax.random.PRNGKey(0)
    kx1, kx2, kc, kr, ki = jax.random.split(key, 5)
    # Stand-ins for the cls_bones / reg_bones tower outputs.
    x_cls = jax.random.normal(kx1, (B, Cin, H, W), dtype=jnp.float32)
    x_reg = jax.random.normal(kx2, (B, Cin, H, W), dtype=jnp.float32)

    # Deterministic init matching the modules' __init__.
    cout_cls = num_anchors * num_cls
    w_cls = 0.01 * jax.random.normal(kc, (cout_cls, Cin, 3, 3), jnp.float32)
    b_cls = jnp.full((cout_cls,), -math.log((1.0 - 0.01) / 0.01), jnp.float32)

    cout_reg = num_anchors * 4
    w_reg = 0.01 * jax.random.normal(kr, (cout_reg, Cin, 3, 3), jnp.float32)
    b_reg = jnp.zeros((cout_reg,), jnp.float32)
    scale = 1.0                             # Scale module (init_val=1.0)

    cout_iou = num_anchors
    w_iou = 0.01 * jax.random.normal(ki, (cout_iou, Cin, 3, 3), jnp.float32)
    b_iou = jnp.zeros((cout_iou,), jnp.float32)

    cls_out = retina_cls_head(x_cls, w_cls, b_cls, num_anchors, num_cls)
    reg_out, iou_out = retina_reg_iou_heads(x_reg, w_reg, b_reg, w_iou, b_iou,
                                            num_anchors, reg_scale=scale)
    cls_out, reg_out, iou_out = jax.block_until_ready(
        (cls_out, reg_out, iou_out))

    assert cls_out.shape == (B, H * W * num_anchors, num_cls), cls_out.shape
    assert reg_out.shape == (B, H * W * num_anchors, 4), reg_out.shape
    assert iou_out.shape == (B, H * W * num_anchors, 1), iou_out.shape

    ref_cls = _ref_head(x_cls, w_cls, b_cls, num_cls)
    ref_reg = scale * _ref_head(x_reg, w_reg, b_reg, 4)
    ref_iou = _ref_head(x_reg, w_iou, b_iou, 1)
    for got, ref in ((cls_out, ref_cls), (reg_out, ref_reg), (iou_out, ref_iou)):
        err = float(jnp.max(jnp.abs(got - ref)))
        assert err < 5e-2, err              # bf16 in/out, f32 MXU accumulation

    print("KERNEL_OK")
</pallas_src>

<mosaic_0001>
module attributes {stable_mosaic.version = 11 : i64} {
  func.func @_conv3x3_kernel(%arg0: i32, %arg1: i32, %arg2: memref<1x192x96xbf16, #tpu.memory_space<vmem>>, %arg3: memref<1x48x96xbf16, #tpu.memory_space<vmem>>, %arg4: memref<3x96x128xbf16, #tpu.memory_space<vmem>>, %arg5: memref<1x128xf32, #tpu.memory_space<vmem>>, %arg6: memref<1x192x128xbf16, #tpu.memory_space<vmem>>, %arg7: memref<240x96xbf16, #tpu.memory_space<vmem>>) attributes {dimension_semantics = [#tpu.dimension_semantics<parallel>, #tpu.dimension_semantics<parallel>], iteration_bounds = array<i64: 2, 2>, scalar_prefetch = 0 : i64, scratch_operands = 1 : i64, tpu.core_type = #tpu.core_type<tc>, window_params = [{transform_indices = @transform_0, window_bounds = array<i64: 1, 192, 96>}, {transform_indices = @transform_1, window_bounds = array<i64: 1, 48, 96>}, {pipeline_mode = #tpu.pipeline_mode<synchronous>, transform_indices = @transform_2, window_bounds = array<i64: 3, 96, 128>}, {pipeline_mode = #tpu.pipeline_mode<synchronous>, transform_indices = @transform_3, window_bounds = array<i64: 1, 128>}, {transform_indices = @transform_4, window_bounds = array<i64: 1, 192, 128>}]} {
    %c0 = arith.constant 0 : index
    %c0_0 = arith.constant 0 : index
    %c0_1 = arith.constant 0 : index
    %0 = vector.load %arg2[%c0, %c0_0, %c0_1] : memref<1x192x96xbf16, #tpu.memory_space<vmem>>, vector<1x192x96xbf16>
    %1 = vector.shape_cast %0 : vector<1x192x96xbf16> to vector<192x96xbf16>
    %c0_2 = arith.constant 0 : index
    %c0_3 = arith.constant 0 : index
    %2 = vector.load %arg7[%c0_2, %c0_3] : memref<240x96xbf16, #tpu.memory_space<vmem>>, vector<192x96xbf16>
    tpu.vector_store %arg7[%c0_2, %c0_3], %1 {strides = array<i32>} : memref<240x96xbf16, #tpu.memory_space<vmem>>, vector<192x96xbf16>,
    %c0_4 = arith.constant 0 : index
    %c0_5 = arith.constant 0 : index
    %c0_6 = arith.constant 0 : index
    %3 = vector.load %arg3[%c0_4, %c0_5, %c0_6] : memref<1x48x96xbf16, #tpu.memory_space<vmem>>, vector<1x48x96xbf16>
    %4 = vector.shape_cast %3 : vector<1x48x96xbf16> to vector<48x96xbf16>
    %c192 = arith.constant 192 : index
    %c0_7 = arith.constant 0 : index
    %5 = vector.load %arg7[%c192, %c0_7] : memref<240x96xbf16, #tpu.memory_space<vmem>>, vector<48x96xbf16>
    tpu.vector_store %arg7[%c192, %c0_7], %4 {strides = array<i32>} : memref<240x96xbf16, #tpu.memory_space<vmem>>, vector<48x96xbf16>,
    %c0_8 = arith.constant 0 : index
    %c0_9 = arith.constant 0 : index
    %6 = vector.load %arg7[%c0_8, %c0_9] : memref<240x96xbf16, #tpu.memory_space<vmem>>, vector<192x96xbf16>
    %c0_10 = arith.constant 0 : index
    %c0_11 = arith.constant 0 : index
    %c0_12 = arith.constant 0 : index
    %7 = vector.load %arg4[%c0_10, %c0_11, %c0_12] : memref<3x96x128xbf16, #tpu.memory_space<vmem>>, vector<1x96x128xbf16>
    %8 = vector.shape_cast %7 : vector<1x96x128xbf16> to vector<96x128xbf16>
    %cst = arith.constant dense<0.000000e+00> : vector<192x128xf32>
    %9 = tpu.matmul %6, %8, %cst {dimension_numbers = #tpu.dot_dimension_numbers<[1], [0], [0], [1], [0, 0, 1, 1], [], []>} : vector<192x96xbf16>, vector<96x128xbf16>, vector<192x128xf32> -> vector<192x128xf32>
    %c24 = arith.constant 24 : index
    %c0_13 = arith.constant 0 : index
    %10 = vector.load %arg7[%c24, %c0_13] : memref<240x96xbf16, #tpu.memory_space<vmem>>, vector<192x96xbf16>
    %c1 = arith.constant 1 : index
    %c0_14 = arith.constant 0 : index
    %c0_15 = arith.constant 0 : index
    %11 = vector.load %arg4[%c1, %c0_14, %c0_15] : memref<3x96x128xbf16, #tpu.memory_space<vmem>>, vector<1x96x128xbf16>
    %12 = vector.shape_cast %11 : vector<1x96x128xbf16> to vector<96x128xbf16>
    %cst_16 = arith.constant dense<0.000000e+00> : vector<192x128xf32>
    %13 = tpu.matmul %10, %12, %cst_16 {dimension_numbers = #tpu.dot_dimension_numbers<[1], [0], [0], [1], [0, 0, 1, 1], [], []>} : vector<192x96xbf16>, vector<96x128xbf16>, vector<192x128xf32> -> vector<192x128xf32>
    %14 = arith.addf %9, %13 : vector<192x128xf32>
    %c48 = arith.constant 48 : index
    %c0_17 = arith.constant 0 : index
    %15 = vector.load %arg7[%c48, %c0_17] : memref<240x96xbf16, #tpu.memory_space<vmem>>, vector<192x96xbf16>
    %c2 = arith.constant 2 : index
    %c0_18 = arith.constant 0 : index
    %c0_19 = arith.constant 0 : index
    %16 = vector.load %arg4[%c2, %c0_18, %c0_19] : memref<3x96x128xbf16, #tpu.memory_space<vmem>>, vector<1x96x128xbf16>
    %17 = vector.shape_cast %16 : vector<1x96x128xbf16> to vector<96x128xbf16>
    %cst_20 = arith.constant dense<0.000000e+00> : vector<192x128xf32>
    %18 = tpu.matmul %15, %17, %cst_20 {dimension_numbers = #tpu.dot_dimension_numbers<[1], [0], [0], [1], [0, 0, 1, 1], [], []>} : vector<192x96xbf16>, vector<96x128xbf16>, vector<192x128xf32> -> vector<192x128xf32>
    %19 = arith.addf %14, %18 : vector<192x128xf32>
    %c0_21 = arith.constant 0 : index
    %c0_22 = arith.constant 0 : index
    %20 = vector.load %arg5[%c0_21, %c0_22] : memref<1x128xf32, #tpu.memory_space<vmem>>, vector<1x128xf32>
    %21 = vector.broadcast %20 : vector<1x128xf32> to vector<192x128xf32>
    %22 = arith.addf %19, %21 : vector<192x128xf32>
    %23 = arith.truncf %22 : vector<192x128xf32> to vector<192x128xbf16>
    %c0_23 = arith.constant 0 : index
    %c0_24 = arith.constant 0 : index
    %c0_25 = arith.constant 0 : index
    %24 = vector.load %arg6[%c0_23, %c0_24, %c0_25] : memref<1x192x128xbf16, #tpu.memory_space<vmem>>, vector<1x192x128xbf16>
    %25 = vector.shape_cast %24 : vector<1x192x128xbf16> to vector<192x128xbf16>
    %26 = vector.shape_cast %23 : vector<192x128xbf16> to vector<1x192x128xbf16>
    tpu.vector_store %arg6[%c0_23, %c0_24, %c0_25], %26 {strides = array<i32>} : memref<1x192x128xbf16, #tpu.memory_space<vmem>>, vector<1x192x128xbf16>,
    return
  }
  func.func @transform_0(%arg0: i32, %arg1: i32) -> (i32, i32, i32) {
    %c0_i32 = arith.constant 0 : i32
    %c0_i32_0 = arith.constant 0 : i32
    return %arg0, %arg1, %c0_i32 : i32, i32, i32
  }
  func.func @transform_1(%arg0: i32, %arg1: i32) -> (i32, i32, i32) {
    %c1_i32 = arith.constant 1 : i32
    %0 = arith.addi %arg1, %c1_i32 : i32
    %c4_i32 = arith.constant 4 : i32
    %1 = arith.muli %0, %c4_i32 : i32
    %c0_i32 = arith.constant 0 : i32
    %c0_i32_0 = arith.constant 0 : i32
    return %arg0, %1, %c0_i32 : i32, i32, i32
  }
  func.func @transform_2(%arg0: i32, %arg1: i32) -> (i32, i32, i32) {
    %c0_i32 = arith.constant 0 : i32
    %c0_i32_0 = arith.constant 0 : i32
    %c0_i32_1 = arith.constant 0 : i32
    %c0_i32_2 = arith.constant 0 : i32
    return %c0_i32, %c0_i32_0, %c0_i32_1 : i32, i32, i32
  }
  func.func @transform_3(%arg0: i32, %arg1: i32) -> (i32, i32) {
    %c0_i32 = arith.constant 0 : i32
    %c0_i32_0 = arith.constant 0 : i32
    %c0_i32_1 = arith.constant 0 : i32
    return %c0_i32, %c0_i32_0 : i32, i32
  }
  func.func @transform_4(%arg0: i32, %arg1: i32) -> (i32, i32, i32) {
    %c0_i32 = arith.constant 0 : i32
    %c0_i32_0 = arith.constant 0 : i32
    return %arg0, %arg1, %c0_i32 : i32, i32, i32
  }
}

</mosaic_0001>

<bundles_post_ra>
// kernel: tpu_custom_call.1
= control target key start
LH: loop header
LB: loop body
LE: loop exit
PB: predicated region body
PF: predicated region fallthrough
CT: control target
= control target key end

     0   :  { %9 = vsyncpa [#allocation4], 0  ;;  %s2534_s0 = inlined_call_operand.vmem [shape: bf16[2,454,96], index: 0, kind: input, shape index: {}]   ;;  %s2535_s1 = inlined_call_operand.vmem [shape: bf16[2,454,96], index: 1, kind: input, shape index: {}]   ;;  %s2536_s2 = inlined_call_operand.vmem [shape: bf16[3,96,128], index: 2, kind: input, shape index: {}]   ;;  %s2537_s3 = inlined_call_operand.vmem [shape: f32[1,128], index: 3, kind: input, shape index: {}]   ;;  %s2538_s4 = inlined_call_operand.hbm [shape: bf16[2,384,128], index: 4, kind: output, shape index: {}]  }
   0x1   :  { %11 = vsyncpa [#allocation4 + $0x1], 0  ;;  %s2140_s15 = smov 0   ;;  %s2142_s16 = smov 0  }
   0x2   :  { %s2144_s17 = smov 0   ;;  %s2146_s18 = smov 0  }
   0x3   :  { %s2148_s19 = smov 0   ;;  %s2150_s20 = smov 0  }
   0x4   :  { %s2152_s21 = smov 0   ;;  %s2154_s22 = smov 0  }
   0x5 LB: > { %s1452_s23 = sadd.s32 4294967295, %s2110_s22   ;;  %s1453_s24 = sadd.s32 4294967294, %s2110_s22   ;;  %s2110_s22 = sphi %s2154_s22, %s17_s22   ;;  %s2106_s21 = sphi %s2152_s21, %s2552_s21   ;;  %s2102_s20 = sphi %s2150_s20, %s2551_s20   ;;  %s2098_s19 = sphi %s2148_s19, %s2550_s19   ;;  %s2094_s18 = sphi %s2146_s18, %s2549_s18   ;;  %s2090_s17 = sphi %s2144_s17, %s2548_s17   ;;  %s2086_s16 = sphi %s2142_s16, %s2547_s16   ;;  %s2082_s15 = sphi %s2140_s15, %s2546_s15  }
   0x6   : > { %s26_s25 = sadd.s32 1, %s2102_s20  ;;  %s29_s26 = sadd.s32 1, %s2106_s21 }
   0x7   : > { %p27_p0 = scmp.ge.s32.totalorder %s26_s25, 2  ;;  %p150_p1 = scmp.ne.s32.totalorder %s2090_s17, %s2086_s16 }
   0x8   : > { %p151_p2 = scmp.eq.s32.totalorder %s1452_s23, 3  ;;  %p156_p5 = scmp.ne.s32.totalorder %s2086_s16, %s2082_s15 }
   0x9   : > { %s2554_s25 = smov (%p27_p0, %s26_s25), 0  ;;  %s2556_s26 = smov (!%p27_p0, %s29_s26), %s2106_s21 }
   0xa   : > { %s136_s27 = ssub.s32 %s2102_s20, %s2554_s25  ;;  %p2191_p3 = por %p151_p2, %p150_p1 }
   0xb   : > { %p31_p4 = scmp.ge.s32.totalorder %s2556_s26, 2  ;;  %p157_p6 = scmp.eq.s32.totalorder %s1453_s24, 3 }
   0xc   : > { %p1458_p7 = scmp.ge.s32.totalorder %s2110_s22, 1  ;;  %p227_p9 = scmp.lt.s32.totalorder %s2110_s22, 5 }
   0xd   : > { %s2558_s26 = smov (%p31_p4, %s2556_s26), 0  ;;  %p2200_p8 = por %p157_p6, %p156_p5 }
   0xe   : > { %2542 = sst [smem:[#allocation6_spill]] %s2558_s26  ;;  %s135_s30 = ssub.s32 %s2106_s21, %s2558_s26 }
   0xf   : > { %s140_s5 = sadd.s32 1, %s2090_s17  ;;  %s137_s6 = sor.u32 %s136_s27, %s135_s30 }
  0x10   : > { %p228_p10 = pnand %p1458_p7, %p227_p9  ;;  %p138_p11 = scmp.eq.s32.totalorder %s137_s6, 0 }
  0x11   : > { %v1983_v0 = vld [vmem:[%s2536_s2 + $0x30] sm:$0xff] (!%p228_p10)   ;;  %s2215_s10 = smul.u32 (!%p228_p10), 24, %s2094_s18  ;;  %v2220_v1 = vld [vmem:[%s2536_s2] sm:$0xff] (!%p228_p10)   ;;  %p281_p12 = scmp.lt.s32.totalorder (!%p228_p10), %s2098_s19, 1  ;;  %v1985_v2 = vld [vmem:[%s2536_s2 + $0x38] sm:$0xff] (!%p228_p10)   ;;  %vm414_vm0 = vcmask (!%p228_p10), 785408  }
  0x12   : > { %s2209_s7 = scalar_select %p138_p11, %s2090_s17, %s140_s5  }
  0x13   : > { %231 = sbr.rel (%p228_p10) target bundleno = 346 (0x15a), region = 36  ;;  %1739 = vmatprep.subr.bf16.mxu1 (!%p228_p10), %v1983_v0  ;;  %p283_p13 = scmp.lt.s32.totalorder (!%p228_p10), %s2215_s10, 56  ;;  %1775 = vmatprep.subr.bf16.mxu0 (!%p228_p10), %v2220_v1  ;;  %v2231_v3 = vld [vmem:[%s2536_s2 + $0x8] sm:$0xff] (!%p228_p10)   ;;  %v1987_v4 = vld [vmem:[%s2536_s2 + $0x40] sm:$0xff] (!%p228_p10)   ;;  %v2245_v5 = vld [vmem:[%s2536_s2 + $0x10] sm:$0xff] (!%p228_p10)   ;;  %vm507_vm1 = vcmask (!%p228_p10), 1043456  }
  0x14   : > { %1740 = vmatpush3.bf16.msra.mxu1 (!%p228_p10), %v1983_v0  ;;  %1776 = vmatpush3.bf16.msra.mxu0 (!%p228_p10), %v2220_v1  ;;  %v1989_v6 = vld [vmem:[%s2536_s2 + $0x48] sm:$0xff] (!%p228_p10)   ;;  %v2258_v7 = vld [vmem:[%s2536_s2 + $0x18] sm:$0xff] (!%p228_p10)   ;;  %s294_s5 = sadd.s32 (!%p228_p10), 1, %s2094_s18  ;;  %v1991_v8 = vld [vmem:[%s2536_s2 + $0x50] sm:$0xff] (!%p228_p10)   ;;  %s2112_s8 = smov (!%p228_p10), [#allocation3]  }
  0x15   : > { %1741 = vmatprep.subr.bf16.mxu1 (!%p228_p10), %v1985_v2  ;;  %1777 = vmatprep.subr.bf16.mxu0 (!%p228_p10), %v2231_v3  ;;  %v2272_v9 = vld [vmem:[%s2536_s2 + $0x20] sm:$0xff] (!%p228_p10)   ;;  %s1461_s18 = smul.u32 (!%p228_p10), 24, %s294_s5  ;;  %v1993_v14 = vld [vmem:[%s2536_s2 + $0x58] sm:$0xff] (!%p228_p10)   ;;  %v2291_v15 = vld [vmem:[%s2536_s2 + $0x28] sm:$0xff] (!%p228_p10)   ;;  %s2020_s9 = sshll.u32 (!%p228_p10), %s2112_s8, 4  ;;  %s2021_s9 = int_to_ptr.vmem [resolvable:$false] %s2020_s9 }
  0x16   : > { %v1999_v18 = vld [vmem:[%s2536_s2 + $0x60] sm:$0xff] (!%p228_p10)   ;;  %v2000_v25 = vld [vmem:[%s2536_s2 + $0x68] sm:$0xff] (!%p228_p10)   ;;  %v2003_v33 = vld [vmem:[%s2536_s2 + $0x70] sm:$0xff] (!%p228_p10)  }
  0x17   : > { %p303_p0 = scmp.lt.s32.totalorder (!%p228_p10), %s1461_s18, 56  ;;  %v2004_v40 = vld [vmem:[%s2536_s2 + $0x78] sm:$0xff] (!%p228_p10)   ;;  %v2007_v52 = vld [vmem:[%s2536_s2 + $0x80] sm:$0xff] (!%p228_p10)   ;;  %v2008_v56 = vld [vmem:[%s2536_s2 + $0x88] sm:$0xff] (!%p228_p10)  }
  0x18   : > { %1742 = vmatpush3.bf16.msra.mxu1 (!%p228_p10), %v1985_v2  ;;  %1778 = vmatpush3.bf16.msra.mxu0 (!%p228_p10), %v2231_v3 }
  0x19   : > { %1743 = vmatprep.subr.bf16.mxu1 (!%p228_p10), %v1987_v4  ;;  %1779 = vmatprep.subr.bf16.mxu0 (!%p228_p10), %v2245_v5 }
  0x1a   : > { %s2234_s27 = scalar_select %p281_p12, %s2098_s19, 1 }
  0x1b   : > { %s284_s6 = scalar_select %p283_p13, %s2215_s10, 56 }
  0x1c   : > { %s2539_s11 = smul.u32 57, %s2234_s27  ;;  %1744 = vmatpush3.bf16.msra.mxu1 %v1987_v4  ;;  %1780 = vmatpush3.bf16.msra.mxu0 %v2245_v5  ;;  %s2560_s18 = smov (!%p303_p0, %s1461_s18), 56 }
  0x1d   : > { %1745 = vmatprep.subr.bf16.mxu1 %v1989_v6  ;;  %1781 = vmatprep.subr.bf16.mxu0 %v2258_v7 }
  0x1e   : > { %s286_s12 = sadd.s32 %s2539_s11, %s284_s6  ;;  %s2544_s6 = smul.u32 57, %s2234_s27 }
  0x1f   : > { %s1459_s23 = sshll.u32 %s286_s12, 2  ;;  %s1909_s11 = smul.u32 48, %s2098_s19 }
  0x20   : > { %s2267_s26 = scalar_lea.vmem %s2534_s0, %s1459_s23  ;;  %1746 = vmatpush3.bf16.msra.mxu1 %v1989_v6  ;;  %1782 = vmatpush3.bf16.msra.mxu0 %v2258_v7  ;;  %s306_s12 = sadd.s32 %s2544_s6, %s2560_s18 }
  0x21   : > { %v1995_v10 = vld [vmem:[%s2267_s26 + $0x8] sm:$0xff]   ;;  %v1996_v11 = vld [vmem:[%s2267_s26 + $0x10] sm:$0xff]   ;;  %v1997_v12 = vld [vmem:[%s2267_s26] sm:$0xff]   ;;  %1747 = vmatprep.subr.bf16.mxu1 %v1991_v8  ;;  %1783 = vmatprep.subr.bf16.mxu0 %v2272_v9  ;;  %s1462_s18 = sshll.u32 %s306_s12, 2  ;;  %s273_s6 = sand.u32 1, %s2086_s16  }
  0x22   : > { %416 = vst.msk [vmem:[#allocation2 + $0x8] sm:$0xff] %vm414_vm0, %v1995_v10  ;;  %417 = vst.msk [vmem:[#allocation2 + $0x10] sm:$0xff] %vm414_vm0, %v1996_v11  ;;  %v1998_v13 = vld [vmem:[%s2267_s26 + $0x18] sm:$0xff]   ;;  %v2001_v16 = vld [vmem:[%s2267_s26 + $0x20] sm:$0xff]   ;;  %s308_s23 = scalar_lea.vmem %s2535_s1, %s1462_s18  ;;  %s1907_s13 = smul.u32 96, %s273_s6 }
  0x23   : > { %415 = vst.msk [vmem:[#allocation2] sm:$0xff] %vm414_vm0, %v1997_v12  ;;  %418 = vst.msk [vmem:[#allocation2 + $0x18] sm:$0xff] %vm414_vm0, %v1998_v13  ;;  %v2002_v17 = vld [vmem:[%s2267_s26 + $0x28] sm:$0xff]   ;;  %v2005_v26 = vld [vmem:[%s2267_s26 + $0x30] sm:$0xff]   ;;  %s1349_s14 = sadd.s32 %s1909_s11, %s2215_s10  ;;  %s2022_s12 = scalar_lea.vmem %s2021_s9, 3072 }
  0x24   : > { %1748 = vmatpush3.bf16.msra.mxu1 %v1991_v8  ;;  %1784 = vmatpush3.bf16.msra.mxu0 %v2272_v9  ;;  %419 = vst.msk [vmem:[#allocation2 + $0x20] sm:$0xff] %vm414_vm0, %v2001_v16  ;;  %420 = vst.msk [vmem:[#allocation2 + $0x28] sm:$0xff] %vm414_vm0, %v2002_v17  ;;  %v2006_v30 = vld [vmem:[%s2267_s26 + $0x38] sm:$0xff]   ;;  %v2009_v37 = vld [vmem:[%s2267_s26 + $0x40] sm:$0xff]   ;;  %s2436_s18 = scalar_lea.vmem [#allocation3], %s1907_s13  ;;  %s1581_s19 = sshll.u32 %s1349_s14, 6 }
  0x25   : > { %1749 = vmatprep.subr.bf16.mxu1 %v1993_v14  ;;  %1785 = vmatprep.subr.bf16.mxu0 %v2291_v15  ;;  %421 = vst.msk [vmem:[#allocation2 + $0x30] sm:$0xff] %vm414_vm0, %v2005_v26  ;;  %422 = vst.msk [vmem:[#allocation2 + $0x38] sm:$0xff] %vm414_vm0, %v2006_v30  ;;  %v2010_v39 = vld [vmem:[%s2267_s26 + $0x48] sm:$0xff]   ;;  %v2011_v41 = vld [vmem:[%s2267_s26 + $0x50] sm:$0xff]   ;;  %s2474_s30 = scalar_lea.hbm %s2538_s4, %s1581_s19 }
  0x26   : > { %423 = vst.msk [vmem:[#allocation2 + $0x40] sm:$0xff] %vm414_vm0, %v2009_v37  ;;  %424 = vst.msk [vmem:[#allocation2 + $0x48] sm:$0xff] %vm414_vm0, %v2010_v39  ;;  %v2012_v43 = vld [vmem:[%s2267_s26 + $0x58] sm:$0xff]   ;;  %v2013_v46 = vld [vmem:[%s308_s23] sm:$0xff]   ;;  %s2482_s26 = scalar_lea.sflag [#allocation4], %s273_s6 }
  0x27   : > { %425 = vst.msk [vmem:[#allocation2 + $0x50] sm:$0xff] %vm414_vm0, %v2011_v41  ;;  %426 = vst.msk [vmem:[#allocation2 + $0x58] sm:$0xff] %vm414_vm0, %v2012_v43  ;;  %v2014_v48 = vld [vmem:[%s308_s23 + $0x8] sm:$0xff]   ;;  %v2015_v50 = vld [vmem:[%s308_s23 + $0x10] sm:$0xff]   ;;  %s1352_s23 = sshll.u32 %s2436_s18, 4  ;;  %s2476_s23 = int_to_ptr.vmem [resolvable:$true] %s1352_s23 }
  0x28   : > { %1750 = vmatpush3.bf16.msra.mxu1 %v1993_v14  ;;  %1786 = vmatpush3.bf16.msra.mxu0 %v2291_v15  ;;  %451 = vst.msk [vmem:[#allocation2 + $0x60] sm:$0xff] %vm414_vm0, %v2013_v46  ;;  %452 = vst.msk [vmem:[#allocation2 + $0x68] sm:$0xff] %vm414_vm0, %v2014_v48  ;;  %v2428_v26 = vld [vmem:[%s2537_s3] ss:$0 sm:$0xff]  ;;  %s2016_s5 = scalar_lea.vmem %s2476_s23, 1536  ;;  %p2023_p5 = scmp.lt.s32.totalorder %s2476_s23, %s2021_s9 }
  0x29   : > { %v456_v19 = vld [vmem:[#allocation2 + $0x10] sm:$0xff]  ;;  %v478_v20 = vld [vmem:[#allocation2 + $0x8] sm:$0xf0]  ;;  %1847 = vmatprep.subr.bf16.mxu1 %v2220_v1  ;;  %1811 = vmatprep.subr.bf16.mxu0 %v1999_v18  ;;  %453 = vst.msk [vmem:[#allocation2 + $0x70] sm:$0xff] %vm414_vm0, %v2015_v50  ;;  %p2017_p1 = scmp.ne.s32.totalorder %s2476_s23, %s2016_s5  ;;  %p2024_p6 = scmp.lt.s32.totalorder %s2022_s12, %s2016_s5 }
  0x2a   : > { %v455_v21 = vld [vmem:[#allocation2 + $0x8] sm:$0xff]  ;;  %v508_v22 = vrot.slane %v478_v20, 4  ;;  %v509_v23 = vrot.slane %v456_v19, 4  ;;  %v454_v24 = vld [vmem:[#allocation2] sm:$0xff]  ;;  %v2309_v27 = vld [vmem:[#allocation2 + $0x18] sm:$0xff] }
  0x2b   : > { %1787 = vmatprep.mubr.msk.bf16.mxu0 %vm414_vm0, %v454_v24  ;;  %v511_v29 = vrot.slane %v2309_v27, 4  ;;  %v2321_v32 = vld [vmem:[#allocation2 + $0x20] sm:$0xff]  ;;  %v2329_v35 = vld [vmem:[#allocation2 + $0x28] sm:$0xff]  ;;  %p2018_p2 = pnand %p2017_p1, %p2191_p3  ;;  %p2025_p7 = por %p2024_p6, %p2023_p5 }
  0x2c   : > { %v510_v28 = vsel %vm507_vm1, %v508_v22, %v509_v23  ;;  %1788 = vmatmul.mubr.msk.bf16.vlgmr.msra.gmra.mrb[0].mxu0 %vm414_vm0, %v455_v21  ;;  %v513_v34 = vrot.slane %v2321_v32, 4  ;;  %v515_v36 = vrot.slane %v2329_v35, 4  ;;  %v2347_v42 = vld [vmem:[#allocation2 + $0x30] sm:$0xff]  ;;  %v2355_v47 = vld [vmem:[#allocation2 + $0x38] sm:$0xff] }
  0x2d   : > { %1751 = vmatprep.mubr.msk.bf16.mxu1 %vm414_vm0, %v510_v28  ;;  %v512_v31 = vsel %vm507_vm1, %v509_v23, %v511_v29  ;;  %1812 = vmatpush3.bf16.msra.mxu0 %v1999_v18  ;;  %v517_v45 = vrot.slane %v2347_v42, 4  ;;  %v519_v51 = vrot.slane %v2355_v47, 4  ;;  %v462_v53 = vld [vmem:[#allocation2 + $0x40] sm:$0xff]  ;;  %v463_v58 = vld [vmem:[#allocation2 + $0x48] sm:$0xff]  ;;  %p2019_p4 = pneg %p2018_p2 }
  0x2e   : > { %1752 = vmatmul.mubr.msk.bf16.vlgmr.msra.gmra.mrb[0].mxu1 %vm414_vm0, %v512_v31  ;;  %1813 = vmatprep.subr.bf16.mxu0 %v2000_v25  ;;  %v514_v38 = vsel %vm507_vm1, %v511_v29, %v513_v34  ;;  %v516_v44 = vsel %vm507_vm1, %v513_v34, %v515_v36  ;;  %v521_v54 = vrot.slane %v462_v53, 4  ;;  %v464_v59 = vld [vmem:[#allocation2 + $0x50] sm:$0xff]  ;;  %v523_v60 = vrot.slane %v463_v58, 4  ;;  %v465_v0 = vld [vmem:[#allocation2 + $0x58] sm:$0xff] }
  0x2f   : > { %1853 = vmatpush3.bf16.msra.mxu1 %v2220_v1  ;;  %1791 = vmatprep.mubr.msk.bf16.mxu0 %vm414_vm0, %v456_v19  ;;  %v518_v49 = vsel %vm507_vm1, %v515_v36, %v517_v45  ;;  %v520_v55 = vsel %vm507_vm1, %v517_v45, %v519_v51  ;;  %v525_v61 = vrot.slane %v464_v59, 4  ;;  %v479_v1 = vld [vmem:[#allocation2 + $0x60] sm:$0xff]  ;;  %v527_v2 = vrot.slane %v465_v0, 4  ;;  %v480_v6 = vld [vmem:[#allocation2 + $0x68] sm:$0xf]  ;;  %p2026_p9 = pnand %p2025_p7, %p2019_p4 }
  0x30   : > { %1848 = vmatprep.subr.bf16.mxu1 %v2231_v3  ;;  %1755 = vmatprep.mubr.msk.bf16.mxu1 %vm414_vm0, %v514_v38  ;;  %v522_v57 = vsel %vm507_vm1, %v519_v51, %v521_v54  ;;  %v524_v62 = vsel %vm507_vm1, %v521_v54, %v523_v60  ;;  %v946_v10 = vld [vmem:[#allocation2 + $0x70] sm:$0xff] }
  0x31   : > { %1814 = vmatpush3.bf16.msra.mxu0 %v2000_v25  ;;  %v526_v63 = vsel %vm507_vm1, %v523_v60, %v525_v61  ;;  %v528_v4 = vsel %vm507_vm1, %v525_v61, %v527_v2 }
  0x32   : > { %1815 = vmatprep.subr.bf16.mxu0 %v2003_v33 }
  0x33   : > { %1854 = vmatpush3.bf16.msra.mxu1 %v2231_v3  ;;  %v529_v3 = vrot.slane %v479_v1, 4 }
  0x34   : > { %1849 = vmatprep.subr.bf16.mxu1 %v2245_v5  ;;  %1792 = vmatmul.mubr.msk.bf16.gmra.mrb[4].mxu0 %vm414_vm0, %v2309_v27 }
  0x35   : > { %1816 = vmatpush3.bf16.msra.mxu0 %v2003_v33  ;;  %1795 = vmatprep.mubr.msk.bf16.mxu0 %vm414_vm0, %v2321_v32 }
  0x36   : > { %1756 = vmatmul.mubr.msk.bf16.gmra.mrb[4].mxu1 %vm414_vm0, %v516_v44  ;;  %1817 = vmatprep.subr.bf16.mxu0 %v2004_v40 }
  0x37   : > { %1759 = vmatprep.mubr.msk.bf16.mxu1 %vm414_vm0, %v518_v49  ;;  %1855 = vmatpush3.bf16.msra.mxu1 %v2245_v5  ;;  %v530_v5 = vsel %vm507_vm1, %v527_v2, %v529_v3 }
  0x38   : > { %1850 = vmatprep.subr.bf16.mxu1 %v2258_v7 }
  0x39   : > { %1818 = vmatpush3.bf16.msra.mxu0 %v2004_v40 }
  0x3a   : > { %1819 = vmatprep.subr.bf16.mxu0 %v2007_v52 }
  0x3b   : > { %1856 = vmatpush3.bf16.msra.mxu1 %v2258_v7  ;;  %v531_v7 = vrot.slane %v480_v6, 4 }
  0x3c   : > { %1796 = vmatmul.mubr.msk.bf16.gmra.mrb[8].mxu0 %vm414_vm0, %v2329_v35  ;;  %1851 = vmatprep.subr.bf16.mxu1 %v2272_v9 }
  0x3d   : > { %1820 = vmatpush3.bf16.msra.mxu0 %v2007_v52  ;;  %1823 = vmatprep.mubr.msk.bf16.mxu0 %vm414_vm0, %v2309_v27  ;;  %v532_v8 = vsel %vm507_vm1, %v529_v3, %v531_v7 }
  0x3e   : > { %1760 = vmatmul.mubr.msk.bf16.gmra.mrb[8].mxu1 %vm414_vm0, %v520_v55  ;;  %1821 = vmatprep.subr.bf16.mxu0 %v2008_v56 }
  0x3f   : > { %1763 = vmatprep.mubr.msk.bf16.mxu1 %vm414_vm0, %v522_v57  ;;  %1857 = vmatpush3.bf16.msra.mxu1 %v2272_v9  ;;  %v945_v9 = vld [vmem:[#allocation2 + $0x68] sm:$0xff] }
  0x40   : > { %1852 = vmatprep.subr.bf16.mxu1 %v2291_v15 }
  0x41   : > { %1822 = vmatpush3.bf16.msra.mxu0 %v2008_v56 }
  0x43   : > { %1858 = vmatpush3.bf16.msra.mxu1 %v2291_v15 }
  0x44   : > { %1824 = vmatmul.mubr.msk.bf16.vlgmr.msra.gmra.mrb[0].mxu0 %vm414_vm0, %v2321_v32 }
  0x45   : > { %1827 = vmatprep.mubr.msk.bf16.mxu0 %vm414_vm0, %v2329_v35 }
  0x46   : > { %1764 = vmatmul.mubr.msk.bf16.gmra.mrb[12].mxu1 %vm414_vm0, %v524_v62 }
  0x47   : > { %1767 = vmatprep.mubr.msk.bf16.mxu1 %vm414_vm0, %v526_v63 }
  0x4c   : > { %1828 = vmatmul.mubr.msk.bf16.gmra.mrb[4].mxu0 %vm414_vm0, %v2347_v42 }
  0x4d   : > { %1831 = vmatprep.mubr.msk.bf16.mxu0 %vm414_vm0, %v2355_v47 }
  0x4e   : > { %1768 = vmatmul.mubr.msk.bf16.gmra.mrb[16].mxu1 %vm414_vm0, %v528_v4 }
  0x4f   : > { %1771 = vmatprep.mubr.msk.bf16.mxu1 %vm414_vm0, %v530_v5 }
  0x54   : > { %1832 = vmatmul.mubr.msk.bf16.gmra.mrb[8].mxu0 %vm414_vm0, %v462_v53 }
  0x55   : > { %1835 = vmatprep.mubr.msk.bf16.mxu0 %vm414_vm0, %v463_v58 }
  0x56   : > { %1772 = vmatmul.mubr.msk.bf16.gmra.mrb[20].mxu1 %vm414_vm0, %v532_v8 }
  0x57   : > { %1799 = vmatprep.mubr.msk.bf16.mxu1 %vm414_vm0, %v2347_v42 }
  0x5c   : > { %1836 = vmatmul.mubr.msk.bf16.gmra.mrb[12].mxu0 %vm414_vm0, %v464_v59 }
  0x5d   : > { %1839 = vmatprep.mubr.msk.bf16.mxu0 %vm414_vm0, %v465_v0 }
  0x5e   : > { %1800 = vmatmul.mubr.msk.bf16.vlgmr.msra.gmra.mrb[12].mxu1 %vm414_vm0, %v2355_v47 }
  0x5f   : > { %1803 = vmatprep.mubr.msk.bf16.mxu1 %vm414_vm0, %v462_v53 }
  0x64   : > { %1840 = vmatmul.mubr.msk.bf16.gmra.mrb[16].mxu0 %vm414_vm0, %v479_v1 }
  0x65   : > { %1843 = vmatprep.mubr.msk.bf16.mxu0 %vm414_vm0, %v945_v9 }
  0x66   : > { %1804 = vmatmul.mubr.msk.bf16.gmra.mrb[16].mxu1 %vm414_vm0, %v463_v58 }
  0x67   : > { %1807 = vmatprep.mubr.msk.bf16.mxu1 %vm414_vm0, %v464_v59 }
  0x6c   : > { %1844 = vmatmul.mubr.msk.bf16.gmra.mrb[20].mxu0 %vm414_vm0, %v946_v10 }
  0x6e   : > { %1808 = vmatmul.mubr.msk.bf16.gmra.mrb[20].mxu1 %vm414_vm0, %v465_v0 }
 0x101   : > { %v1753_v11 = vpop.f32.mrb[0].mxu1 }
 0x102   : > { %v639_v12 = vpop.f32.mrb[1].mxu1 }
 0x103   : > { %v1754_v13 = vpop.f32.mrb[2].mxu1 }
 0x104   : > { %v642_v14 = vpop.f32.mrb[3].mxu1 }
 0x109   : > { %v1757_v15 = vpop.f32.mrb[4].mxu1 }
 0x10a   : > { %v655_v16 = vpop.f32.mrb[5].mxu1 }
 0x10b   : > { %v1758_v17 = vpop.f32.mrb[6].mxu1 }
 0x10c   : > { %v658_v18 = vpop.f32.mrb[7].mxu1 }
 0x111   : > { %v1761_v19 = vpop.f32.mrb[8].mxu1 }
 0x112   : > { %v671_v20 = vpop.f32.mrb[9].mxu1 }
 0x113   : > { %v1762_v21 = vpop.f32.mrb[10].mxu1 }
 0x114   : > { %v674_v22 = vpop.f32.mrb[11].mxu1 }
 0x117   : > { %v1825_v23 = vpop.f32.mrb[0].mxu0 }
 0x118   : > { %v1859_v24 = vadd.f32 %v1825_v23, %v1753_v11  ;;  %v1066_v25 = vpop.f32.mrb[1].mxu0 }
 0x119   : > { %v1860_v27 = vadd.f32 %v1066_v25, %v639_v12  ;;  %v1826_v28 = vpop.f32.mrb[2].mxu0 }
 0x11a   : > { %v1861_v29 = vadd.f32 %v1826_v28, %v1754_v13  ;;  %v1069_v30 = vpop.f32.mrb[3].mxu0  ;;  %v1194_v32 = vadd.f32 %v1859_v24, %v2428_v26 }
 0x11b   : > { %v1862_v31 = vadd.f32 %v1069_v30, %v642_v14  ;;  %v1192_v34 = vadd.f32 %v1860_v27, %v2428_v26 }
 0x11c   : > { %v1195_v33 = vadd.f32 %v1861_v29, %v2428_v26 }
 0x11d   : > { %v1193_v35 = vadd.f32 %v1862_v31, %v2428_v26 }
 0x11e   : > { %v1622_v36 = vpack.c.bf16 %v1195_v33, %v1194_v32 }
 0x11f   : > { %v1617_v37 = vpack.c.bf16 %v1193_v35, %v1192_v34  ;;  %v1829_v38 = vpop.f32.mrb[4].mxu0 }
 0x120   : > { %1674 = vst [vmem:[%s2436_s18 + $0x8] sm:$0xff] %v1622_v36   ;;  %v1863_v39 = vadd.f32 %v1829_v38, %v1757_v15  ;;  %v1082_v40 = vpop.f32.mrb[5].mxu0 }
 0x121   : > { %1618 = vst [vmem:[%s2436_s18] sm:$0xff] %v1617_v37   ;;  %v1864_v41 = vadd.f32 %v1082_v40, %v655_v16  ;;  %v1830_v42 = vpop.f32.mrb[6].mxu0 }
 0x122   : > { %v1865_v43 = vadd.f32 %v1830_v42, %v1758_v17  ;;  %v1085_v44 = vpop.f32.mrb[7].mxu0  ;;  %v1198_v46 = vadd.f32 %v1863_v39, %v2428_v26 }
 0x123   : > { %v1866_v45 = vadd.f32 %v1085_v44, %v658_v18  ;;  %v1196_v48 = vadd.f32 %v1864_v41, %v2428_v26 }
 0x124   : > { %v1199_v47 = vadd.f32 %v1865_v43, %v2428_v26 }
 0x125   : > { %v1197_v49 = vadd.f32 %v1866_v45, %v2428_v26 }
 0x126   : > { %v1632_v50 = vpack.c.bf16 %v1199_v47, %v1198_v46 }
 0x127   : > { %v1627_v51 = vpack.c.bf16 %v1197_v49, %v1196_v48  ;;  %v1833_v52 = vpop.f32.mrb[8].mxu0 }
 0x128   : > { %1676 = vst [vmem:[%s2436_s18 + $0x18] sm:$0xff] %v1632_v50   ;;  %v1867_v53 = vadd.f32 %v1833_v52, %v1761_v19  ;;  %v1098_v54 = vpop.f32.mrb[9].mxu0 }
 0x129   : > { %1675 = vst [vmem:[%s2436_s18 + $0x10] sm:$0xff] %v1627_v51   ;;  %v1868_v55 = vadd.f32 %v1098_v54, %v671_v20  ;;  %v1834_v56 = vpop.f32.mrb[10].mxu0 }
 0x12a   : > { %v1869_v57 = vadd.f32 %v1834_v56, %v1762_v21  ;;  %v1101_v58 = vpop.f32.mrb[11].mxu0  ;;  %v1202_v60 = vadd.f32 %v1867_v53, %v2428_v26 }
 0x12b   : > { %v1870_v59 = vadd.f32 %v1101_v58, %v674_v22  ;;  %v1200_v62 = vadd.f32 %v1868_v55, %v2428_v26 }
 0x12c   : > { %v1203_v61 = vadd.f32 %v1869_v57, %v2428_v26 }
 0x12d   : > { %v1201_v63 = vadd.f32 %v1870_v59, %v2428_v26 }
 0x12e   : > { %v1642_v0 = vpack.c.bf16 %v1203_v61, %v1202_v60 }
 0x12f   : > { %v1637_v1 = vpack.c.bf16 %v1201_v63, %v1200_v62  ;;  %v1837_v2 = vpop.f32.mrb[12].mxu0 }
 0x130   : > { %1678 = vst [vmem:[%s2436_s18 + $0x28] sm:$0xff] %v1642_v0   ;;  %v1114_v4 = vpop.f32.mrb[13].mxu0 }
 0x131   : > { %v1801_v3 = vpop.f32.mrb[12].mxu1  ;;  %1677 = vst [vmem:[%s2436_s18 + $0x20] sm:$0xff] %v1637_v1   ;;  %v1838_v7 = vpop.f32.mrb[14].mxu0 }
 0x132   : > { %v1871_v5 = vadd.f32 %v1837_v2, %v1801_v3  ;;  %v888_v6 = vpop.f32.mrb[13].mxu1  ;;  %v1117_v10 = vpop.f32.mrb[15].mxu0 }
 0x133   : > { %v1872_v8 = vadd.f32 %v1114_v4, %v888_v6  ;;  %v1802_v9 = vpop.f32.mrb[14].mxu1 }
 0x134   : > { %v1873_v11 = vadd.f32 %v1838_v7, %v1802_v9  ;;  %v891_v12 = vpop.f32.mrb[15].mxu1  ;;  %v1206_v14 = vadd.f32 %v1871_v5, %v2428_v26 }
 0x135   : > { %v1874_v13 = vadd.f32 %v1117_v10, %v891_v12  ;;  %v1204_v16 = vadd.f32 %v1872_v8, %v2428_v26 }
 0x136   : > { %v1207_v15 = vadd.f32 %v1873_v11, %v2428_v26 }
 0x137   : > { %v1205_v17 = vadd.f32 %v1874_v13, %v2428_v26  ;;  %v1841_v19 = vpop.f32.mrb[16].mxu0 }
 0x138   : > { %v1652_v18 = vpack.c.bf16 %v1207_v15, %v1206_v14  ;;  %v1130_v22 = vpop.f32.mrb[17].mxu0 }
 0x139   : > { %v1647_v20 = vpack.c.bf16 %v1205_v17, %v1204_v16  ;;  %v1805_v21 = vpop.f32.mrb[16].mxu1  ;;  %v1842_v25 = vpop.f32.mrb[18].mxu0 }
 0x13a   : > { %1680 = vst [vmem:[%s2436_s18 + $0x38] sm:$0xff] %v1652_v18   ;;  %v1875_v23 = vadd.f32 %v1841_v19, %v1805_v21  ;;  %v904_v24 = vpop.f32.mrb[17].mxu1  ;;  %v1133_v29 = vpop.f32.mrb[19].mxu0 }
 0x13b   : > { %1679 = vst [vmem:[%s2436_s18 + $0x30] sm:$0xff] %v1647_v20   ;;  %v1876_v27 = vadd.f32 %v1130_v22, %v904_v24  ;;  %v1806_v28 = vpop.f32.mrb[18].mxu1 }
 0x13c   : > { %v1877_v30 = vadd.f32 %v1842_v25, %v1806_v28  ;;  %v907_v31 = vpop.f32.mrb[19].mxu1  ;;  %v1210_v33 = vadd.f32 %v1875_v23, %v2428_v26 }
 0x13d   : > { %v1878_v32 = vadd.f32 %v1133_v29, %v907_v31  ;;  %v1208_v35 = vadd.f32 %v1876_v27, %v2428_v26 }
 0x13e   : > { %v1211_v34 = vadd.f32 %v1877_v30, %v2428_v26 }
 0x13f   : > { %v1209_v36 = vadd.f32 %v1878_v32, %v2428_v26  ;;  %v1845_v38 = vpop.f32.mrb[20].mxu0 }
 0x140   : > { %v1662_v37 = vpack.c.bf16 %v1211_v34, %v1210_v33  ;;  %v1146_v41 = vpop.f32.mrb[21].mxu0 }
 0x141   : > { %v1657_v39 = vpack.c.bf16 %v1209_v36, %v1208_v35  ;;  %v1809_v40 = vpop.f32.mrb[20].mxu1  ;;  %v1846_v44 = vpop.f32.mrb[22].mxu0 }
 0x142   : > { %1682 = vst [vmem:[%s2436_s18 + $0x48] sm:$0xff] %v1662_v37   ;;  %v1879_v42 = vadd.f32 %v1845_v38, %v1809_v40  ;;  %v920_v43 = vpop.f32.mrb[21].mxu1  ;;  %v1149_v47 = vpop.f32.mrb[23].mxu0 }
 0x143   : > { %1681 = vst [vmem:[%s2436_s18 + $0x40] sm:$0xff] %v1657_v39   ;;  %v1880_v45 = vadd.f32 %v1146_v41, %v920_v43  ;;  %v1810_v46 = vpop.f32.mrb[22].mxu1 }
 0x144   : > { %v1881_v48 = vadd.f32 %v1846_v44, %v1810_v46  ;;  %v923_v49 = vpop.f32.mrb[23].mxu1  ;;  %v1214_v51 = vadd.f32 %v1879_v42, %v2428_v26 }
 0x145   : > { %v1882_v50 = vadd.f32 %v1149_v47, %v923_v49  ;;  %v1212_v53 = vadd.f32 %v1880_v45, %v2428_v26 }
 0x146   : > { %v1215_v52 = vadd.f32 %v1881_v48, %v2428_v26 }
 0x147   : > { %v1213_v54 = vadd.f32 %v1882_v50, %v2428_v26 }
 0x148   : > { %v1672_v55 = vpack.c.bf16 %v1215_v52, %v1214_v51 }
 0x149   : > { %v1667_v56 = vpack.c.bf16 %v1213_v54, %v1212_v53 }
 0x14a   : > { %1684 = vst [vmem:[%s2436_s18 + $0x58] sm:$0xff] %v1672_v55  }
 0x14b   : > { %1683 = vst [vmem:[%s2436_s18 + $0x50] sm:$0xff] %v1667_v56  }
 0x14c   : > { %2029 = shalt.err (!%p2026_p9)
}
 0x14d   : > { %s2030_s6 = scalar_lea.hbm %s2474_s30, 1536  ;;  %s2034_s18 = scalar_lea.hbm %s2538_s4, 6144 }
 0x14e   : > { %p2031_p10 = scmp.ne.s32.totalorder %s2474_s30, %s2030_s6  ;;  %p2035_p13 = scmp.lt.u32.totalorder %s2474_s30, %s2538_s4 }
 0x14f   : > { %p2036_p0 = scmp.lt.u32.totalorder %s2034_s18, %s2030_s6  ;;  %p2038_p2 = scmp.lt.u32.totalorder %s2030_s6, %s2474_s30 }
 0x150   : > { %p2032_p11 = pnand %p2031_p10, %p2191_p3 }
 0x151   : > { %p2037_p1 = por %p2036_p0, %p2035_p13 }
 0x152   : > { %p2033_p12 = pneg %p2032_p11 }
 0x153   : > { %p2039_p4 = por %p2038_p2, %p2037_p1 }
 0x155   : > { %p2040_p5 = pnand %p2039_p4, %p2033_p12 }
 0x157   : > { %2043 = shalt.err (!%p2040_p5)
}
 0x158   : > { %s2113_s19 = smov 64   ;;  %s2114_s10 = smov 4  }
 0x159   : > { %1910 = dma.vmem_to_hbm [thread:$0]  (%p2191_p3), %s2476_s23, 1536, %s2474_s30, %s2482_s26, %s2113_s19, %s2113_s19, %s2114_s10  }
 0x15a PF: > { %p1916_p6 = scmp.ge.s32.totalorder %s2110_s22, 2  ;;  %s1367_s24 = sand.u32 1, %s2082_s15  }
 0x15b   : > { %s1368_s5 = scalar_lea.sflag [#allocation4], %s1367_s24 }
 0x15c   : > { %p1913_p7 = pnand %p1916_p6, %p2200_p8 }
 0x15e   : > { %2077 = dma.done.wait (!%p1913_p7), %s1368_s5, 1536  }
 0x15f   : > { %2079 = vsyncadd (!%p1913_p7), %s1368_s5, 4294965760  ;;  %s17_s22 = sadd.s32 1, %s2110_s22   ;;  %s2545_s28 = sld [smem:[#allocation6_spill]] }
 0x160   : > { %p14_p9 = scmp.ge.s32.totalorder %s17_s22, 6   ;;  %s2546_s15 = smov %s2086_s16 }
 0x161   : > { %s2547_s16 = smov %s2090_s17  ;;  %s2548_s17 = smov %s2209_s7 }
 0x162   : > { %s2549_s18 = smov %s2102_s20  ;;  %s2550_s19 = smov %s2106_s21 }
 0x163   : > { %s2551_s20 = smov %s2554_s25  ;;  %16 = sbr.rel (!%p14_p9) target bundleno = 5 (0x5), region = 76 }
 0x165   : > { %s2552_s21 = smov %s2545_s28 }
 0x16a   :  { %1373 = vsyncpa [#allocation4], 1 }
 0x16b   :  { %1375 = vsyncpa [#allocation4 + $0x1], 1 }

</bundles_post_ra>
